<compile_context>
chip_gen: v7x
topology: tpu7x:2x2x1
jax: 0.10.0
libtpu: 0.0.40
codegen_flags: <defaults>
</compile_context>

<pallas_src>
import jax
import jax.numpy as jnp
from jax.experimental import pallas as pl
from jax.experimental.pallas import tpu as pltpu

D = 32    # emb_dim
T = 2     # max_visit (GRU sequence length)
V2 = 16   # vocab_size[2] (number of medications)


def _round16(n):
    return (n + 15) // 16 * 16


def _sigmoid(x):
    # sigmoid(x) == 0.5 * (tanh(x/2) + 1): one EUP op, no full-precision divide.
    return 0.5 * (jnp.tanh(0.5 * x) + 1.0)


def _make_kernel(meta, B, Tn, Ld, Lp):
    """Fused forward kernel. All offsets/sizes are static Python ints."""
    E0, VPAD = meta["E0"], meta["VPAD"]
    WIH0, WHH0 = meta["WIH0"], meta["WHH0"]
    WQ0, W10, W20 = meta["WQ0"], meta["W10"], meta["W20"]
    ADJ0, ADJROWS, BIAS0 = meta["ADJ0"], meta["ADJROWS"], meta["BIAS0"]
    V2n = meta["V2"]
    Lt = Ld + Lp
    R = max(((Tn * B + 7) // 8) * 8, 8)   # padded token rows (time-major: t*B+b)
    H2 = 2 * D                            # merged hidden width (= 64)

    def kernel(tok_ref, slab_ref, result_ref, neg_ref):
        tok = tok_ref[...]                                   # (R, Lt+1) int32
        vlen = tok[0:B, Lt:Lt + 1]                           # (B, 1) visit lengths

        # --- merged embedding lookup: one one-hot-count matrix, ONE MXU dot ---
        # combined vocab: diag id -> id, pro id -> id + (V0+1); padding rows are zero.
        iota = jax.lax.broadcasted_iota(jnp.int32, (R, VPAD), 1)
        counts = jnp.zeros((R, VPAD), jnp.float32)
        for l in range(Lt):                                  # Lt tiny & static
            counts = counts + (iota == tok[:, l:l + 1]).astype(jnp.float32)
        emb = slab_ref[E0:E0 + VPAD, :]                      # (VPAD, 128) bf16
        x = jnp.dot(counts.astype(jnp.bfloat16), emb,
                    preferred_element_type=jnp.float32)      # (R,128): [x1 | x2 | 0]
        # TODO(synk): nn.Dropout(p=0.5) treated as eval-mode identity (no RNG mask).

        # --- bias tile: one aligned load, rows sliced as values ---
        bias = slab_ref[BIAS0:BIAS0 + 16, :].astype(jnp.float32)
        bih = jnp.concatenate([bias[0:1, :], bias[1:2, :]], axis=1)   # (1, 256)
        bhh = jnp.concatenate([bias[2:3, :], bias[3:4, :]], axis=1)   # (1, 256)

        # --- merged block-diagonal gate-major GRU: h = [h1 | h2] -----------------
        # (64,192) matrices stored as two 64x128 row blocks; reassembled once.
        wih = jnp.concatenate([slab_ref[WIH0:WIH0 + H2, :],
                               slab_ref[WIH0 + H2:WIH0 + 2 * H2, :]], axis=1)
        whh = jnp.concatenate([slab_ref[WHH0:WHH0 + H2, :],
                               slab_ref[WHH0 + H2:WHH0 + 2 * H2, :]], axis=1)

        xp = jnp.dot(x[:, 0:H2].astype(jnp.bfloat16), wih,
                     preferred_element_type=jnp.float32) + bih        # (R, 256)

        h = jnp.zeros((B, H2), jnp.float32)
        o_last = jnp.zeros((B, H2), jnp.float32)
        for t in range(Tn):                                  # T tiny & static
            gx = xp[t * B:(t + 1) * B, :]                    # (B, 256) time-major rows
            gh = jnp.dot(h.astype(jnp.bfloat16), whh,
                         preferred_element_type=jnp.float32) + bhh    # 1 recurrent dot
            r = _sigmoid(gx[:, 0:H2] + gh[:, 0:H2])
            z = _sigmoid(gx[:, H2:2 * H2] + gh[:, H2:2 * H2])
            n = jnp.tanh(gx[:, 2 * H2:3 * H2] + r * gh[:, 2 * H2:3 * H2])
            h = (1.0 - z) * n + z * h
            # emulate o[i, visit_len[i]-1, :] with a per-step select
            o_last = jnp.where((vlen - 1) == t, h, o_last)

        # --- query = Linear(ReLU([o1 | o2]))  (h already is the concat) ----------
        cat = jnp.maximum(o_last, 0.0)
        q = jnp.dot(cat.astype(jnp.bfloat16), slab_ref[WQ0:WQ0 + H2, :],
                    preferred_element_type=jnp.float32) + bias[4:5, :]  # (B,128)
        # normed_query = ||q||/(1+||q||) * q/||q|| == q / (1 + ||q||)   (exact divide)
        norm = jnp.sqrt(jnp.sum(q * q, axis=1, keepdims=True))
        normed_q = q / (1.0 + norm)

        # --- final_map: Linear(D->D) -> ReLU -> Linear(D->V2) -> LayerNorm(V2) ---
        h1 = jnp.maximum(
            jnp.dot(normed_q[:, 0:D].astype(jnp.bfloat16), slab_ref[W10:W10 + D, :],
                    preferred_element_type=jnp.float32) + bias[5:6, :], 0.0)
        logits = jnp.dot(h1[:, 0:D].astype(jnp.bfloat16), slab_ref[W20:W20 + D, :],
                         preferred_element_type=jnp.float32) + bias[6:7, :]
        lg = logits[:, 0:V2n]
        mu = jnp.mean(lg, axis=-1, keepdims=True)
        var = jnp.mean((lg - mu) ** 2, axis=-1, keepdims=True)
        result = ((lg - mu) * jax.lax.rsqrt(var + 1e-5)
                  * bias[7:8, 0:V2n] + bias[7:8, V2n:2 * V2n])
        result_ref[...] = result

        # --- DDI penalty: 0.0005 * sum_b s_b^T A s_b -> SMEM scalar ---------------
        s = _sigmoid(result)
        sa = jnp.dot(s.astype(jnp.bfloat16), slab_ref[ADJ0:ADJ0 + ADJROWS, :],
                     preferred_element_type=jnp.float32)
        neg_ref[0, 0] = 0.0005 * jnp.sum(sa[:, 0:V2n] * s)

    return kernel


def pack_params(params):
    """Packs everything into one bf16 (rows, 128) slab with 16-row-aligned sections:
    stacked embedding table, block-diagonal gate-major fused GRU weights, linear
    layers, DDI adjacency and one 8x128 bias tile."""
    V0 = params["emb0"].shape[0] - 1
    V1 = params["emb1"].shape[0] - 1
    V2n = params["w2"].shape[1]
    assert 2 * V2n <= 128
    Vtot = (V0 + 1) + (V1 + 1)
    VPAD = _round16(Vtot)
    H2 = 2 * D

    def bd(a, b):                         # two (D,D) -> (2D,2D) block-diagonal
        out = jnp.zeros((H2, H2), jnp.float32)
        return out.at[0:D, 0:D].set(a).at[D:H2, D:H2].set(b)

    # gate-major ([r|z|n]) block-diagonal fused GRU weights (2D, 3*2D) and biases
    wih_bd = jnp.concatenate([bd(params["wih1"][g], params["wih2"][g]) for g in range(3)], axis=1)
    whh_bd = jnp.concatenate([bd(params["whh1"][g], params["whh2"][g]) for g in range(3)], axis=1)
    bih_bd = jnp.concatenate([jnp.concatenate([params["bih1"][g], params["bih2"][g]], axis=1)
                              for g in range(3)], axis=1)
    bhh_bd = jnp.concatenate([jnp.concatenate([params["bhh1"][g], params["bhh2"][g]], axis=1)
                              for g in range(3)], axis=1)

    # stacked embedding table: diag ids -> rows [0, V0], pro ids -> rows [V0+1, Vtot)
    emb = jnp.zeros((VPAD, H2), jnp.float32)
    emb = emb.at[0:V0 + 1, 0:D].set(params["emb0"])
    emb = emb.at[V0 + 1:Vtot, D:H2].set(params["emb1"])

    ADJROWS = _round16(V2n)
    E0 = 0
    WIH0 = E0 + VPAD
    WHH0 = WIH0 + 2 * H2
    WQ0 = WHH0 + 2 * H2
    W10 = WQ0 + H2
    W20 = W10 + _round16(D)
    ADJ0 = W20 + _round16(D)
    BIAS0 = ADJ0 + ADJROWS
    ROWS = BIAS0 + 16

    slab = jnp.zeros((ROWS, 128), jnp.float32)
    slab = slab.at[E0:E0 + VPAD, 0:H2].set(emb)
    # (64,192) gate-major matrices stored as [cols 0:128] + [cols 128:192] row blocks
    slab = slab.at[WIH0:WIH0 + H2, 0:128].set(wih_bd[:, 0:128])
    slab = slab.at[WIH0 + H2:WIH0 + 2 * H2, 0:H2].set(wih_bd[:, 128:192])
    slab = slab.at[WHH0:WHH0 + H2, 0:128].set(whh_bd[:, 0:128])
    slab = slab.at[WHH0 + H2:WHH0 + 2 * H2, 0:H2].set(whh_bd[:, 128:192])
    slab = slab.at[WQ0:WQ0 + H2, 0:D].set(params["wq"])
    slab = slab.at[W10:W10 + D, 0:D].set(params["w1"])
    slab = slab.at[W20:W20 + D, 0:V2n].set(params["w2"])
    slab = slab.at[ADJ0:ADJ0 + V2n, 0:V2n].set(params["ddi_adj"])
    # one 8x128 bias tile: rows 0/1 = bih, 2/3 = bhh, 4 = bq, 5 = b1, 6 = b2,
    # row 7 = [gamma | beta]
    slab = slab.at[BIAS0 + 0, 0:128].set(bih_bd[0, 0:128])
    slab = slab.at[BIAS0 + 1, 0:H2].set(bih_bd[0, 128:192])
    slab = slab.at[BIAS0 + 2, 0:128].set(bhh_bd[0, 0:128])
    slab = slab.at[BIAS0 + 3, 0:H2].set(bhh_bd[0, 128:192])
    slab = slab.at[BIAS0 + 4, 0:D].set(params["bq"][0])
    slab = slab.at[BIAS0 + 5, 0:D].set(params["b1"][0])
    slab = slab.at[BIAS0 + 6, 0:V2n].set(params["b2"][0])
    slab = slab.at[BIAS0 + 7, 0:V2n].set(params["ln_gamma"][0])
    slab = slab.at[BIAS0 + 7, V2n:2 * V2n].set(params["ln_beta"][0])

    meta = dict(E0=E0, VPAD=VPAD, WIH0=WIH0, WHH0=WHH0, WQ0=WQ0, W10=W10, W20=W20,
                ADJ0=ADJ0, ADJROWS=ADJROWS, BIAS0=BIAS0, V0=V0, V1=V1, V2=V2n)
    # bf16 slab: MXU operands on v6e/v7x; all post-dot math stays f32 in-kernel.
    return slab.astype(jnp.bfloat16), meta


def build_forward(packed):
    slab, meta = packed
    V0, V2n = meta["V0"], meta["V2"]
    vmem = pl.BlockSpec(memory_space=pltpu.MemorySpace.VMEM)
    smem = pl.BlockSpec(memory_space=pltpu.MemorySpace.SMEM)

    def forward(diag, pro, visit_len):
        B, Tn, Ld = diag.shape
        Lp = pro.shape[2]
        Lt = Ld + Lp
        R = max(((Tn * B + 7) // 8) * 8, 8)

        # ONE packed int32 input (single data DMA): time-major rows t*B+b of
        # [diag ids | pro ids + (V0+1) | visit_len[b]]; filler never matches the iota.
        diag_tm = jnp.swapaxes(diag.astype(jnp.int32), 0, 1).reshape(Tn * B, Ld)
        pro_tm = jnp.swapaxes(pro.astype(jnp.int32), 0, 1).reshape(Tn * B, Lp) + (V0 + 1)
        vl_tm = jnp.tile(visit_len.astype(jnp.int32).reshape(1, B), (Tn, 1)).reshape(Tn * B, 1)
        tok = jnp.full((R, Lt + 1), 1 << 20, jnp.int32)
        tok = tok.at[0:Tn * B, :].set(jnp.concatenate([diag_tm, pro_tm, vl_tm], axis=1))

        kernel = _make_kernel(meta, B, Tn, Ld, Lp)
        # NOTE: for large batch add a batch grid axis with
        # dimension_semantics=("parallel",) to use v7x's second TensorCore;
        # at B=2 a grid is pure overhead, so stay gridless.
        result, neg = pl.pallas_call(
            kernel,
            out_shape=(jax.ShapeDtypeStruct((B, V2n), jnp.float32),
                       jax.ShapeDtypeStruct((1, 1), jnp.float32)),
            in_specs=[vmem, vmem],
            out_specs=(vmem, smem),
        )(tok, slab)
        frag_loss = 0.0   # args.use_mol_net = False path
        return result, neg[0, 0], frag_loss

    return jax.jit(forward)


def init_params(key, vocab_size, emb_dim=D):
    ks = jax.random.split(key, 17)

    def rnd(k, shape, scale=0.1):
        return (scale * jax.random.normal(k, shape)).astype(jnp.float32)

    emb0 = rnd(ks[0], (vocab_size[0] + 1, emb_dim)).at[vocab_size[0]].set(0.0)  # padding_idx
    emb1 = rnd(ks[1], (vocab_size[1] + 1, emb_dim)).at[vocab_size[1]].set(0.0)  # padding_idx
    params = dict(
        emb0=emb0, emb1=emb1,
        # GRU weights packed per gate (r, z, n): (3, in, out), biases (3, 1, out)
        wih1=rnd(ks[2], (3, emb_dim, emb_dim)),
        whh1=rnd(ks[3], (3, emb_dim, emb_dim)),
        bih1=rnd(ks[4], (3, 1, emb_dim)),
        bhh1=rnd(ks[5], (3, 1, emb_dim)),
        wih2=rnd(ks[6], (3, emb_dim, emb_dim)),
        whh2=rnd(ks[7], (3, emb_dim, emb_dim)),
        bih2=rnd(ks[8], (3, 1, emb_dim)),
        bhh2=rnd(ks[9], (3, 1, emb_dim)),
        wq=rnd(ks[10], (2 * emb_dim, emb_dim)),
        bq=rnd(ks[11], (1, emb_dim)),
        w1=rnd(ks[12], (emb_dim, emb_dim)),
        b1=rnd(ks[13], (1, emb_dim)),
        w2=rnd(ks[14], (emb_dim, vocab_size[2])),
        b2=rnd(ks[15], (1, vocab_size[2])),
        ln_gamma=jnp.ones((1, vocab_size[2]), jnp.float32),
        ln_beta=jnp.zeros((1, vocab_size[2]), jnp.float32),
    )
    # Deterministic symmetric 0/1 DDI adjacency with zero diagonal.
    a = (jax.random.uniform(ks[16], (vocab_size[2], vocab_size[2])) > 0.7).astype(jnp.float32)
    adj = jnp.triu(a, 1)
    params["ddi_adj"] = adj + adj.T
    return params


if __name__ == "__main__":
    vocab_size = (20, 15, V2)          # (diag vocab, proc vocab, med vocab)
    key = jax.random.PRNGKey(0)
    kp, kd, kr, _ = jax.random.split(key, 4)
    params = init_params(kp, vocab_size)
    packed = pack_params(params)       # one-time parameter packing (offline)
    forward = build_forward(packed)

    B, ml_diag, ml_pro = 2, 4, 3
    diag = jax.random.randint(kd, (B, T, ml_diag), 0, vocab_size[0] + 1)   # includes pad idx
    pro = jax.random.randint(kr, (B, T, ml_pro), 0, vocab_size[1] + 1)
    visit_len = jnp.array([1, 2], dtype=jnp.int32)

    result, batch_neg, frag_loss = forward(diag, pro, visit_len)
    jax.block_until_ready((result, batch_neg))
    print("KERNEL_OK")
</pallas_src>

<mosaic_0001>
module attributes {stable_mosaic.version = 11 : i64} {
  func.func @kernel(%arg0: memref<8x8xi32, #tpu.memory_space<vmem>>, %arg1: memref<464x128xbf16, #tpu.memory_space<vmem>>, %arg2: memref<2x16xf32, #tpu.memory_space<vmem>>, %arg3: memref<1x1xf32, #tpu.memory_space<smem>>) attributes {dimension_semantics = [], scalar_prefetch = 0 : i64, scratch_operands = 0 : i64, tpu.core_type = #tpu.core_type<tc>} {
    %c0 = arith.constant 0 : index
    %c0_0 = arith.constant 0 : index
    %0 = vector.load %arg0[%c0, %c0_0] : memref<8x8xi32, #tpu.memory_space<vmem>>, vector<8x8xi32>
    %1 = vector.extract_strided_slice %0 {offsets = [0, 7], sizes = [2, 1], strides = [1, 1]} : vector<8x8xi32> to vector<2x1xi32>
    %2 = tpu.iota {dimensions = array<i32: 1>} : vector<8x48xi32>
    %cst = arith.constant 0.000000e+00 : f32
    %3 = vector.broadcast %cst : f32 to vector<8x48xf32>
    %4 = vector.extract_strided_slice %0 {offsets = [0, 0], sizes = [8, 1], strides = [1, 1]} : vector<8x8xi32> to vector<8x1xi32>
    %5 = vector.broadcast %4 : vector<8x1xi32> to vector<8x48xi32>
    %6 = arith.cmpi eq, %2, %5 : vector<8x48xi32>
    %7 = arith.extui %6 : vector<8x48xi1> to vector<8x48xi32>
    %8 = arith.sitofp %7 : vector<8x48xi32> to vector<8x48xf32>
    %9 = arith.addf %3, %8 : vector<8x48xf32>
    %10 = vector.extract_strided_slice %0 {offsets = [0, 1], sizes = [8, 1], strides = [1, 1]} : vector<8x8xi32> to vector<8x1xi32>
    %11 = vector.broadcast %10 : vector<8x1xi32> to vector<8x48xi32>
    %12 = arith.cmpi eq, %2, %11 : vector<8x48xi32>
    %13 = arith.extui %12 : vector<8x48xi1> to vector<8x48xi32>
    %14 = arith.sitofp %13 : vector<8x48xi32> to vector<8x48xf32>
    %15 = arith.addf %9, %14 : vector<8x48xf32>
    %16 = vector.extract_strided_slice %0 {offsets = [0, 2], sizes = [8, 1], strides = [1, 1]} : vector<8x8xi32> to vector<8x1xi32>
    %17 = vector.broadcast %16 : vector<8x1xi32> to vector<8x48xi32>
    %18 = arith.cmpi eq, %2, %17 : vector<8x48xi32>
    %19 = arith.extui %18 : vector<8x48xi1> to vector<8x48xi32>
    %20 = arith.sitofp %19 : vector<8x48xi32> to vector<8x48xf32>
    %21 = arith.addf %15, %20 : vector<8x48xf32>
    %22 = vector.extract_strided_slice %0 {offsets = [0, 3], sizes = [8, 1], strides = [1, 1]} : vector<8x8xi32> to vector<8x1xi32>
    %23 = vector.broadcast %22 : vector<8x1xi32> to vector<8x48xi32>
    %24 = arith.cmpi eq, %2, %23 : vector<8x48xi32>
    %25 = arith.extui %24 : vector<8x48xi1> to vector<8x48xi32>
    %26 = arith.sitofp %25 : vector<8x48xi32> to vector<8x48xf32>
    %27 = arith.addf %21, %26 : vector<8x48xf32>
    %28 = vector.extract_strided_slice %0 {offsets = [0, 4], sizes = [8, 1], strides = [1, 1]} : vector<8x8xi32> to vector<8x1xi32>
    %29 = vector.broadcast %28 : vector<8x1xi32> to vector<8x48xi32>
    %30 = arith.cmpi eq, %2, %29 : vector<8x48xi32>
    %31 = arith.extui %30 : vector<8x48xi1> to vector<8x48xi32>
    %32 = arith.sitofp %31 : vector<8x48xi32> to vector<8x48xf32>
    %33 = arith.addf %27, %32 : vector<8x48xf32>
    %34 = vector.extract_strided_slice %0 {offsets = [0, 5], sizes = [8, 1], strides = [1, 1]} : vector<8x8xi32> to vector<8x1xi32>
    %35 = vector.broadcast %34 : vector<8x1xi32> to vector<8x48xi32>
    %36 = arith.cmpi eq, %2, %35 : vector<8x48xi32>
    %37 = arith.extui %36 : vector<8x48xi1> to vector<8x48xi32>
    %38 = arith.sitofp %37 : vector<8x48xi32> to vector<8x48xf32>
    %39 = arith.addf %33, %38 : vector<8x48xf32>
    %40 = vector.extract_strided_slice %0 {offsets = [0, 6], sizes = [8, 1], strides = [1, 1]} : vector<8x8xi32> to vector<8x1xi32>
    %41 = vector.broadcast %40 : vector<8x1xi32> to vector<8x48xi32>
    %42 = arith.cmpi eq, %2, %41 : vector<8x48xi32>
    %43 = arith.extui %42 : vector<8x48xi1> to vector<8x48xi32>
    %44 = arith.sitofp %43 : vector<8x48xi32> to vector<8x48xf32>
    %45 = arith.addf %39, %44 : vector<8x48xf32>
    %c0_1 = arith.constant 0 : index
    %c0_2 = arith.constant 0 : index
    %46 = vector.load %arg1[%c0_1, %c0_2] : memref<464x128xbf16, #tpu.memory_space<vmem>>, vector<48x128xbf16>
    %47 = arith.truncf %45 : vector<8x48xf32> to vector<8x48xbf16>
    %cst_3 = arith.constant dense<0.000000e+00> : vector<8x128xf32>
    %48 = tpu.matmul %47, %46, %cst_3 {dimension_numbers = #tpu.dot_dimension_numbers<[1], [0], [0], [1], [0, 0, 1, 1], [], []>} : vector<8x48xbf16>, vector<48x128xbf16>, vector<8x128xf32> -> vector<8x128xf32>
    %c448 = arith.constant 448 : index
    %c0_4 = arith.constant 0 : index
    %49 = vector.load %arg1[%c448, %c0_4] : memref<464x128xbf16, #tpu.memory_space<vmem>>, vector<16x128xbf16>
    %50 = arith.extf %49 : vector<16x128xbf16> to vector<16x128xf32>
    %51 = vector.extract_strided_slice %50 {offsets = [0, 0], sizes = [1, 128], strides = [1, 1]} : vector<16x128xf32> to vector<1x128xf32>
    %52 = vector.extract_strided_slice %50 {offsets = [1, 0], sizes = [1, 128], strides = [1, 1]} : vector<16x128xf32> to vector<1x128xf32>
    %53 = tpu.concatenate %51, %52 in 1 : vector<1x128xf32>, vector<1x128xf32> -> vector<1x256xf32>
    %54 = vector.extract_strided_slice %50 {offsets = [2, 0], sizes = [1, 128], strides = [1, 1]} : vector<16x128xf32> to vector<1x128xf32>
    %55 = vector.extract_strided_slice %50 {offsets = [3, 0], sizes = [1, 128], strides = [1, 1]} : vector<16x128xf32> to vector<1x128xf32>
    %56 = tpu.concatenate %54, %55 in 1 : vector<1x128xf32>, vector<1x128xf32> -> vector<1x256xf32>
    %c48 = arith.constant 48 : index
    %c0_5 = arith.constant 0 : index
    %57 = vector.load %arg1[%c48, %c0_5] : memref<464x128xbf16, #tpu.memory_space<vmem>>, vector<64x128xbf16>
    %c112 = arith.constant 112 : index
    %c0_6 = arith.constant 0 : index
    %58 = vector.load %arg1[%c112, %c0_6] : memref<464x128xbf16, #tpu.memory_space<vmem>>, vector<64x128xbf16>
    %59 = tpu.concatenate %57, %58 in 1 : vector<64x128xbf16>, vector<64x128xbf16> -> vector<64x256xbf16>
    %c176 = arith.constant 176 : index
    %c0_7 = arith.constant 0 : index
    %60 = vector.load %arg1[%c176, %c0_7] : memref<464x128xbf16, #tpu.memory_space<vmem>>, vector<64x128xbf16>
    %c240 = arith.constant 240 : index
    %c0_8 = arith.constant 0 : index
    %61 = vector.load %arg1[%c240, %c0_8] : memref<464x128xbf16, #tpu.memory_space<vmem>>, vector<64x128xbf16>
    %62 = tpu.concatenate %60, %61 in 1 : vector<64x128xbf16>, vector<64x128xbf16> -> vector<64x256xbf16>
    %63 = vector.extract_strided_slice %48 {offsets = [0, 0], sizes = [8, 64], strides = [1, 1]} : vector<8x128xf32> to vector<8x64xf32>
    %64 = arith.truncf %63 : vector<8x64xf32> to vector<8x64xbf16>
    %cst_9 = arith.constant dense<0.000000e+00> : vector<8x256xf32>
    %65 = tpu.matmul %64, %59, %cst_9 {dimension_numbers = #tpu.dot_dimension_numbers<[1], [0], [0], [1], [0, 0, 1, 1], [], []>} : vector<8x64xbf16>, vector<64x256xbf16>, vector<8x256xf32> -> vector<8x256xf32>
    %66 = vector.broadcast %53 : vector<1x256xf32> to vector<8x256xf32>
    %67 = arith.addf %65, %66 : vector<8x256xf32>
    %cst_10 = arith.constant 0.000000e+00 : f32
    %68 = vector.broadcast %cst_10 : f32 to vector<2x64xf32>
    %cst_11 = arith.constant 0.000000e+00 : f32
    %69 = vector.broadcast %cst_11 : f32 to vector<2x64xf32>
    %70 = vector.extract_strided_slice %67 {offsets = [0, 0], sizes = [2, 256], strides = [1, 1]} : vector<8x256xf32> to vector<2x256xf32>
    %71 = arith.truncf %68 : vector<2x64xf32> to vector<2x64xbf16>
    %cst_12 = arith.constant dense<0.000000e+00> : vector<2x256xf32>
    %72 = tpu.matmul %71, %62, %cst_12 {dimension_numbers = #tpu.dot_dimension_numbers<[1], [0], [0], [1], [0, 0, 1, 1], [], []>} : vector<2x64xbf16>, vector<64x256xbf16>, vector<2x256xf32> -> vector<2x256xf32>
    %73 = vector.broadcast %56 : vector<1x256xf32> to vector<2x256xf32>
    %74 = arith.addf %72, %73 : vector<2x256xf32>
    %75 = vector.extract_strided_slice %70 {offsets = [0, 0], sizes = [2, 64], strides = [1, 1]} : vector<2x256xf32> to vector<2x64xf32>
    %76 = vector.extract_strided_slice %74 {offsets = [0, 0], sizes = [2, 64], strides = [1, 1]} : vector<2x256xf32> to vector<2x64xf32>
    %77 = arith.addf %75, %76 : vector<2x64xf32>
    %cst_13 = arith.constant 5.000000e-01 : f32
    %78 = vector.broadcast %cst_13 : f32 to vector<2x64xf32>
    %79 = arith.mulf %78, %77 : vector<2x64xf32>
    %80 = math.tanh %79 : vector<2x64xf32>
    %cst_14 = arith.constant 1.000000e+00 : f32
    %81 = vector.broadcast %cst_14 : f32 to vector<2x64xf32>
    %82 = arith.addf %80, %81 : vector<2x64xf32>
    %cst_15 = arith.constant 5.000000e-01 : f32
    %83 = vector.broadcast %cst_15 : f32 to vector<2x64xf32>
    %84 = arith.mulf %83, %82 : vector<2x64xf32>
    %85 = vector.extract_strided_slice %70 {offsets = [0, 64], sizes = [2, 64], strides = [1, 1]} : vector<2x256xf32> to vector<2x64xf32>
    %86 = vector.extract_strided_slice %74 {offsets = [0, 64], sizes = [2, 64], strides = [1, 1]} : vector<2x256xf32> to vector<2x64xf32>
    %87 = arith.addf %85, %86 : vector<2x64xf32>
    %cst_16 = arith.constant 5.000000e-01 : f32
    %88 = vector.broadcast %cst_16 : f32 to vector<2x64xf32>
    %89 = arith.mulf %88, %87 : vector<2x64xf32>
    %90 = math.tanh %89 : vector<2x64xf32>
    %cst_17 = arith.constant 1.000000e+00 : f32
    %91 = vector.broadcast %cst_17 : f32 to vector<2x64xf32>
    %92 = arith.addf %90, %91 : vector<2x64xf32>
    %cst_18 = arith.constant 5.000000e-01 : f32
    %93 = vector.broadcast %cst_18 : f32 to vector<2x64xf32>
    %94 = arith.mulf %93, %92 : vector<2x64xf32>
    %95 = vector.extract_strided_slice %70 {offsets = [0, 128], sizes = [2, 64], strides = [1, 1]} : vector<2x256xf32> to vector<2x64xf32>
    %96 = vector.extract_strided_slice %74 {offsets = [0, 128], sizes = [2, 64], strides = [1, 1]} : vector<2x256xf32> to vector<2x64xf32>
    %97 = arith.mulf %84, %96 : vector<2x64xf32>
    %98 = arith.addf %95, %97 : vector<2x64xf32>
    %99 = math.tanh %98 : vector<2x64xf32>
    %cst_19 = arith.constant 1.000000e+00 : f32
    %100 = vector.broadcast %cst_19 : f32 to vector<2x64xf32>
    %101 = arith.subf %100, %94 : vector<2x64xf32>
    %102 = arith.mulf %101, %99 : vector<2x64xf32>
    %103 = arith.mulf %94, %68 : vector<2x64xf32>
    %104 = arith.addf %102, %103 : vector<2x64xf32>
    %c1_i32 = arith.constant 1 : i32
    %105 = vector.broadcast %c1_i32 : i32 to vector<2x1xi32>
    %106 = arith.subi %1, %105 : vector<2x1xi32>
    %c0_i32 = arith.constant 0 : i32
    %107 = vector.broadcast %c0_i32 : i32 to vector<2x1xi32>
    %108 = arith.cmpi eq, %106, %107 : vector<2x1xi32>
    %109 = vector.shape_cast %108 : vector<2x1xi1> to vector<2x1xi1>
    %110 = vector.broadcast %109 : vector<2x1xi1> to vector<2x64xi1>
    %111 = arith.select %110, %104, %69 : vector<2x64xi1>, vector<2x64xf32>
    %112 = vector.extract_strided_slice %67 {offsets = [2, 0], sizes = [2, 256], strides = [1, 1]} : vector<8x256xf32> to vector<2x256xf32>
    %113 = arith.truncf %104 : vector<2x64xf32> to vector<2x64xbf16>
    %cst_20 = arith.constant dense<0.000000e+00> : vector<2x256xf32>
    %114 = tpu.matmul %113, %62, %cst_20 {dimension_numbers = #tpu.dot_dimension_numbers<[1], [0], [0], [1], [0, 0, 1, 1], [], []>} : vector<2x64xbf16>, vector<64x256xbf16>, vector<2x256xf32> -> vector<2x256xf32>
    %115 = vector.broadcast %56 : vector<1x256xf32> to vector<2x256xf32>
    %116 = arith.addf %114, %115 : vector<2x256xf32>
    %117 = vector.extract_strided_slice %112 {offsets = [0, 0], sizes = [2, 64], strides = [1, 1]} : vector<2x256xf32> to vector<2x64xf32>
    %118 = vector.extract_strided_slice %116 {offsets = [0, 0], sizes = [2, 64], strides = [1, 1]} : vector<2x256xf32> to vector<2x64xf32>
    %119 = arith.addf %117, %118 : vector<2x64xf32>
    %cst_21 = arith.constant 5.000000e-01 : f32
    %120 = vector.broadcast %cst_21 : f32 to vector<2x64xf32>
    %121 = arith.mulf %120, %119 : vector<2x64xf32>
    %122 = math.tanh %121 : vector<2x64xf32>
    %cst_22 = arith.constant 1.000000e+00 : f32
    %123 = vector.broadcast %cst_22 : f32 to vector<2x64xf32>
    %124 = arith.addf %122, %123 : vector<2x64xf32>
    %cst_23 = arith.constant 5.000000e-01 : f32
    %125 = vector.broadcast %cst_23 : f32 to vector<2x64xf32>
    %126 = arith.mulf %125, %124 : vector<2x64xf32>
    %127 = vector.extract_strided_slice %112 {offsets = [0, 64], sizes = [2, 64], strides = [1, 1]} : vector<2x256xf32> to vector<2x64xf32>
    %128 = vector.extract_strided_slice %116 {offsets = [0, 64], sizes = [2, 64], strides = [1, 1]} : vector<2x256xf32> to vector<2x64xf32>
    %129 = arith.addf %127, %128 : vector<2x64xf32>
    %cst_24 = arith.constant 5.000000e-01 : f32
    %130 = vector.broadcast %cst_24 : f32 to vector<2x64xf32>
    %131 = arith.mulf %130, %129 : vector<2x64xf32>
    %132 = math.tanh %131 : vector<2x64xf32>
    %cst_25 = arith.constant 1.000000e+00 : f32
    %133 = vector.broadcast %cst_25 : f32 to vector<2x64xf32>
    %134 = arith.addf %132, %133 : vector<2x64xf32>
    %cst_26 = arith.constant 5.000000e-01 : f32
    %135 = vector.broadcast %cst_26 : f32 to vector<2x64xf32>
    %136 = arith.mulf %135, %134 : vector<2x64xf32>
    %137 = vector.extract_strided_slice %112 {offsets = [0, 128], sizes = [2, 64], strides = [1, 1]} : vector<2x256xf32> to vector<2x64xf32>
    %138 = vector.extract_strided_slice %116 {offsets = [0, 128], sizes = [2, 64], strides = [1, 1]} : vector<2x256xf32> to vector<2x64xf32>
    %139 = arith.mulf %126, %138 : vector<2x64xf32>
    %140 = arith.addf %137, %139 : vector<2x64xf32>
    %141 = math.tanh %140 : vector<2x64xf32>
    %cst_27 = arith.constant 1.000000e+00 : f32
    %142 = vector.broadcast %cst_27 : f32 to vector<2x64xf32>
    %143 = arith.subf %142, %136 : vector<2x64xf32>
    %144 = arith.mulf %143, %141 : vector<2x64xf32>
    %145 = arith.mulf %136, %104 : vector<2x64xf32>
    %146 = arith.addf %144, %145 : vector<2x64xf32>
    %c1_i32_28 = arith.constant 1 : i32
    %147 = vector.broadcast %c1_i32_28 : i32 to vector<2x1xi32>
    %148 = arith.subi %1, %147 : vector<2x1xi32>
    %c1_i32_29 = arith.constant 1 : i32
    %149 = vector.broadcast %c1_i32_29 : i32 to vector<2x1xi32>
    %150 = arith.cmpi eq, %148, %149 : vector<2x1xi32>
    %151 = vector.shape_cast %150 : vector<2x1xi1> to vector<2x1xi1>
    %152 = vector.broadcast %151 : vector<2x1xi1> to vector<2x64xi1>
    %153 = arith.select %152, %146, %111 : vector<2x64xi1>, vector<2x64xf32>
    %cst_30 = arith.constant 0.000000e+00 : f32
    %154 = vector.broadcast %cst_30 : f32 to vector<2x64xf32>
    %155 = arith.maximumf %153, %154 : vector<2x64xf32>
    %156 = arith.truncf %155 : vector<2x64xf32> to vector<2x64xbf16>
    %c304 = arith.constant 304 : index
    %c0_31 = arith.constant 0 : index
    %157 = vector.load %arg1[%c304, %c0_31] : memref<464x128xbf16, #tpu.memory_space<vmem>>, vector<64x128xbf16>
    %cst_32 = arith.constant dense<0.000000e+00> : vector<2x128xf32>
    %158 = tpu.matmul %156, %157, %cst_32 {dimension_numbers = #tpu.dot_dimension_numbers<[1], [0], [0], [1], [0, 0, 1, 1], [], []>} : vector<2x64xbf16>, vector<64x128xbf16>, vector<2x128xf32> -> vector<2x128xf32>
    %159 = vector.extract_strided_slice %50 {offsets = [4, 0], sizes = [1, 128], strides = [1, 1]} : vector<16x128xf32> to vector<1x128xf32>
    %160 = vector.broadcast %159 : vector<1x128xf32> to vector<2x128xf32>
    %161 = arith.addf %158, %160 : vector<2x128xf32>
    %162 = arith.mulf %161, %161 : vector<2x128xf32>
    %cst_33 = arith.constant dense<0.000000e+00> : vector<2xf32>
    %163 = vector.multi_reduction <add>, %162, %cst_33 [1] : vector<2x128xf32> to vector<2xf32>
    %164 = vector.shape_cast %163 : vector<2xf32> to vector<2x1xf32>
    %165 = math.sqrt %164 : vector<2x1xf32>
    %cst_34 = arith.constant 1.000000e+00 : f32
    %166 = vector.broadcast %cst_34 : f32 to vector<2x1xf32>
    %167 = arith.addf %166, %165 : vector<2x1xf32>
    %168 = vector.broadcast %167 : vector<2x1xf32> to vector<2x128xf32>
    %169 = arith.divf %161, %168 : vector<2x128xf32>
    %170 = vector.extract_strided_slice %169 {offsets = [0, 0], sizes = [2, 32], strides = [1, 1]} : vector<2x128xf32> to vector<2x32xf32>
    %171 = arith.truncf %170 : vector<2x32xf32> to vector<2x32xbf16>
    %c368 = arith.constant 368 : index
    %c0_35 = arith.constant 0 : index
    %172 = vector.load %arg1[%c368, %c0_35] : memref<464x128xbf16, #tpu.memory_space<vmem>>, vector<32x128xbf16>
    %cst_36 = arith.constant dense<0.000000e+00> : vector<2x128xf32>
    %173 = tpu.matmul %171, %172, %cst_36 {dimension_numbers = #tpu.dot_dimension_numbers<[1], [0], [0], [1], [0, 0, 1, 1], [], []>} : vector<2x32xbf16>, vector<32x128xbf16>, vector<2x128xf32> -> vector<2x128xf32>
    %174 = vector.extract_strided_slice %50 {offsets = [5, 0], sizes = [1, 128], strides = [1, 1]} : vector<16x128xf32> to vector<1x128xf32>
    %175 = vector.broadcast %174 : vector<1x128xf32> to vector<2x128xf32>
    %176 = arith.addf %173, %175 : vector<2x128xf32>
    %cst_37 = arith.constant 0.000000e+00 : f32
    %177 = vector.broadcast %cst_37 : f32 to vector<2x128xf32>
    %178 = arith.maximumf %176, %177 : vector<2x128xf32>
    %179 = vector.extract_strided_slice %178 {offsets = [0, 0], sizes = [2, 32], strides = [1, 1]} : vector<2x128xf32> to vector<2x32xf32>
    %180 = arith.truncf %179 : vector<2x32xf32> to vector<2x32xbf16>
    %c400 = arith.constant 400 : index
    %c0_38 = arith.constant 0 : index
    %181 = vector.load %arg1[%c400, %c0_38] : memref<464x128xbf16, #tpu.memory_space<vmem>>, vector<32x128xbf16>
    %cst_39 = arith.constant dense<0.000000e+00> : vector<2x128xf32>
    %182 = tpu.matmul %180, %181, %cst_39 {dimension_numbers = #tpu.dot_dimension_numbers<[1], [0], [0], [1], [0, 0, 1, 1], [], []>} : vector<2x32xbf16>, vector<32x128xbf16>, vector<2x128xf32> -> vector<2x128xf32>
    %183 = vector.extract_strided_slice %50 {offsets = [6, 0], sizes = [1, 128], strides = [1, 1]} : vector<16x128xf32> to vector<1x128xf32>
    %184 = vector.broadcast %183 : vector<1x128xf32> to vector<2x128xf32>
    %185 = arith.addf %182, %184 : vector<2x128xf32>
    %186 = vector.extract_strided_slice %185 {offsets = [0, 0], sizes = [2, 16], strides = [1, 1]} : vector<2x128xf32> to vector<2x16xf32>
    %cst_40 = arith.constant dense<0.000000e+00> : vector<2xf32>
    %187 = vector.multi_reduction <add>, %186, %cst_40 [1] : vector<2x16xf32> to vector<2xf32>
    %188 = vector.shape_cast %187 : vector<2xf32> to vector<2x1xf32>
    %cst_41 = arith.constant 1.600000e+01 : f32
    %189 = vector.broadcast %cst_41 : f32 to vector<2x1xf32>
    %190 = arith.divf %188, %189 : vector<2x1xf32>
    %191 = vector.broadcast %190 : vector<2x1xf32> to vector<2x16xf32>
    %192 = arith.subf %186, %191 : vector<2x16xf32>
    %193 = arith.mulf %192, %192 : vector<2x16xf32>
    %cst_42 = arith.constant dense<0.000000e+00> : vector<2xf32>
    %194 = vector.multi_reduction <add>, %193, %cst_42 [1] : vector<2x16xf32> to vector<2xf32>
    %195 = vector.shape_cast %194 : vector<2xf32> to vector<2x1xf32>
    %cst_43 = arith.constant 1.600000e+01 : f32
    %196 = vector.broadcast %cst_43 : f32 to vector<2x1xf32>
    %197 = arith.divf %195, %196 : vector<2x1xf32>
    %198 = vector.broadcast %190 : vector<2x1xf32> to vector<2x16xf32>
    %199 = arith.subf %186, %198 : vector<2x16xf32>
    %cst_44 = arith.constant 9.99999974E-6 : f32
    %200 = vector.broadcast %cst_44 : f32 to vector<2x1xf32>
    %201 = arith.addf %197, %200 : vector<2x1xf32>
    %202 = math.rsqrt %201 : vector<2x1xf32>
    %203 = vector.broadcast %202 : vector<2x1xf32> to vector<2x16xf32>
    %204 = arith.mulf %199, %203 : vector<2x16xf32>
    %205 = vector.extract_strided_slice %50 {offsets = [7, 0], sizes = [1, 16], strides = [1, 1]} : vector<16x128xf32> to vector<1x16xf32>
    %206 = vector.broadcast %205 : vector<1x16xf32> to vector<2x16xf32>
    %207 = arith.mulf %204, %206 : vector<2x16xf32>
    %208 = vector.extract_strided_slice %50 {offsets = [7, 16], sizes = [1, 16], strides = [1, 1]} : vector<16x128xf32> to vector<1x16xf32>
    %209 = vector.broadcast %208 : vector<1x16xf32> to vector<2x16xf32>
    %210 = arith.addf %207, %209 : vector<2x16xf32>
    %c0_45 = arith.constant 0 : index
    %c0_46 = arith.constant 0 : index
    %211 = vector.load %arg2[%c0_45, %c0_46] : memref<2x16xf32, #tpu.memory_space<vmem>>, vector<2x16xf32>
    tpu.vector_store %arg2[%c0_45, %c0_46], %210 {strides = array<i32>} : memref<2x16xf32, #tpu.memory_space<vmem>>, vector<2x16xf32>,
    %cst_47 = arith.constant 5.000000e-01 : f32
    %212 = vector.broadcast %cst_47 : f32 to vector<2x16xf32>
    %213 = arith.mulf %212, %210 : vector<2x16xf32>
    %214 = math.tanh %213 : vector<2x16xf32>
    %cst_48 = arith.constant 1.000000e+00 : f32
    %215 = vector.broadcast %cst_48 : f32 to vector<2x16xf32>
    %216 = arith.addf %214, %215 : vector<2x16xf32>
    %cst_49 = arith.constant 5.000000e-01 : f32
    %217 = vector.broadcast %cst_49 : f32 to vector<2x16xf32>
    %218 = arith.mulf %217, %216 : vector<2x16xf32>
    %219 = arith.truncf %218 : vector<2x16xf32> to vector<2x16xbf16>
    %c432 = arith.constant 432 : index
    %c0_50 = arith.constant 0 : index
    %220 = vector.load %arg1[%c432, %c0_50] : memref<464x128xbf16, #tpu.memory_space<vmem>>, vector<16x128xbf16>
    %cst_51 = arith.constant dense<0.000000e+00> : vector<2x128xf32>
    %221 = tpu.matmul %219, %220, %cst_51 {dimension_numbers = #tpu.dot_dimension_numbers<[1], [0], [0], [1], [0, 0, 1, 1], [], []>} : vector<2x16xbf16>, vector<16x128xbf16>, vector<2x128xf32> -> vector<2x128xf32>
    %222 = vector.extract_strided_slice %221 {offsets = [0, 0], sizes = [2, 16], strides = [1, 1]} : vector<2x128xf32> to vector<2x16xf32>
    %223 = arith.mulf %222, %218 : vector<2x16xf32>
    %224 = vector.shape_cast %223 : vector<2x16xf32> to vector<1x2x16xf32>
    %cst_52 = arith.constant dense<0.000000e+00> : vector<1xf32>
    %225 = vector.multi_reduction <add>, %224, %cst_52 [1, 2] : vector<1x2x16xf32> to vector<1xf32>
    %226 = vector.shape_cast %225 : vector<1xf32> to vector<1x1x1xf32>
    %227 = vector.extract %226[0, 0, 0] : f32 from vector<1x1x1xf32>
    %cst_53 = arith.constant 5.000000e-04 : f32
    %228 = arith.mulf %cst_53, %227 : f32
    %c0_54 = arith.constant 0 : index
    %c0_55 = arith.constant 0 : index
    %229 = memref.load %arg3[%c0_54, %c0_55] : memref<1x1xf32, #tpu.memory_space<smem>>
    memref.store %228, %arg3[%c0_54, %c0_55] : memref<1x1xf32, #tpu.memory_space<smem>>
    return
  }
}

</mosaic_0001>

<bundles_post_ra>
// kernel: tile.0
= control target key start
LH: loop header
LB: loop body
LE: loop exit
PB: predicated region body
PF: predicated region fallthrough
CT: control target
= control target key end

     0   :  { %vm7_vm0 = vcmask 7168   ;;  %s39_s0 = inlined_call_operand.vmem [shape: s32[2,1,1,2], index: 0, kind: input, shape index: {}]   ;;  %s40_s1 = inlined_call_operand.vmem [shape: s32[4,1], index: 1, kind: output, shape index: {}]  }
   0x1   :  { %v4_v0 = vld [vmem:[%s39_s0] sm:$0x3]  ;;  %s22_s0 = smov 127  }
   0x2   :  { %5 = vst [vmem:[#allocation1] sm:$0x3] %v4_v0 }
   0x9   :  { %v9_v1 = vld [vmem:[#allocation1] sm:$0x3]  }
   0xa   :  { %v6_v2 = vld [vmem:[#allocation1] sm:$0x3]   ;;  %10 = vrot.lane.b32.xlu0 %v9_v1, %s22_s0 }
   0xb   :  { %8 = vst.msk [vmem:[#allocation0] ss:$2 sm:$0x3] %vm7_vm0, %v6_v2  }
  0x7c   :  { %v11_v3 = vpop.permute.xlu0 %10  }
  0x7d   :  { %14 = vst.msk [vmem:[#allocation0 + $0x1] ss:$2 sm:$0x3] %vm7_vm0, %v11_v3  }
  0x84   :  { %v18_v4 = vld [vmem:[#allocation0] sm:$0xf] }
  0x85   :  { %20 = vst [vmem:[%s40_s1] sm:$0xf] %v18_v4 }

// kernel: tile.6
= control target key start
LH: loop header
LB: loop body
LE: loop exit
PB: predicated region body
PF: predicated region fallthrough
CT: control target
= control target key end

     0   :  { %s22_s0 = inlined_call_operand.vmem [shape: s32[2], index: 0, kind: input, shape index: {}]   ;;  %s23_s1 = inlined_call_operand.vmem [shape: s32[2,1,1,2], index: 1, kind: output, shape index: {}]  }
   0x1   :  { %v4_v0 = vld [vmem:[%s22_s0] ss:$0 sm:$0xff] }
   0x2   :  { %5 = vst [vmem:[%s23_s1] sm:$0x3] %v4_v0 }

// kernel: forward.1
= control target key start
LH: loop header
LB: loop body
LE: loop exit
PB: predicated region body
PF: predicated region fallthrough
CT: control target
= control target key end

     0   :  { %9 = vsyncpa [#allocation3], 0  ;;  %s1253_s0 = inlined_call_operand.vmem [shape: s32[8,8], index: 0, kind: input, shape index: {}]   ;;  %s1254_s1 = inlined_call_operand.hbm [shape: bf16[464,128], index: 1, kind: input, shape index: {}]   ;;  %s1255_s2 = inlined_call_operand.hbm [shape: f32[2,16], index: 2, kind: output, shape index: {0}]   ;;  %s1256_s3 = inlined_call_operand.hbm [shape: f32[1,1], index: 3, kind: output, shape index: {1}]  }
   0x1   :  { %10 = vsyncpa [#allocation4], 0 }
   0x2   :  { %11 = vsyncpa [#allocation5], 0  ;;  %s1094_s12 = smov [#allocation2]   ;;  %s1034_s16 = scalar_lea.hbm %s1254_s1, 3712 }
   0x3   :  { %s19_s13 = sshll.u32 %s1094_s12, 4  ;;  %p1035_p0 = scmp.ne.s32.totalorder %s1254_s1, %s1034_s16  ;;  %s20_s13 = int_to_ptr.vmem [resolvable:$true] %s19_s13 }
   0x4   :  { %p1038_p1 = scmp.lt.u32.totalorder %s1034_s16, %s1254_s1 }
   0x6   :  { %p1040_p2 = pnand %p1038_p1, %p1035_p0 }
   0x8   :  { %1043 = shalt.err (!%p1040_p2)
}
   0x9   :  { %s1044_s21 = scalar_lea.vmem %s20_s13, 3712  ;;  %p1049_p4 = scmp.lt.s32.totalorder %s20_s13, %s20_s13 }
   0xa   :  { %p1045_p3 = scmp.ne.s32.totalorder %s20_s13, %s1044_s21  ;;  %p1050_p5 = scmp.lt.s32.totalorder %s1044_s21, %s1044_s21 }
   0xc   :  { %p1051_p6 = por %p1050_p5, %p1049_p4 }
   0xe   :  { %p1052_p7 = pnand %p1051_p6, %p1045_p3 }
  0x10   :  { %1055 = shalt.err (!%p1052_p7)
}
  0x11   :  { %s1095_s22 = smov 64   ;;  %s1096_s23 = smov 4  }
  0x12   :  { %25 = dma.hbm_to_vmem [thread:$0]  %s1254_s1, 3712, %s20_s13, [#allocation3], %s1095_s22, %s1095_s22, %s1096_s23  }
  0x13   :  { %1088 = dma.done.wait [#allocation3], 3712  }
  0x14   :  { %1089 = vsyncadd [#allocation3], 4294963584  ;;  %v1097_v0 = vmov 2   ;;  %v1098_v1 = vmov 0   ;;  %v1099_v2 = vmov 0.0   ;;  %v1150_v3 = vld [vmem:[%s1253_s0] sm:$0xff]  ;;  %v31_v20 = vlaneseq }
  0x15   :  { %978 = vset.pattern.permute.xlu1 %v1097_v0  ;;  %976 = vset.pattern.permute.xlu0 %v1098_v1  ;;  %v1100_v4 = vmov 3   ;;  %v1101_v5 = vmov 1   ;;  %v990_v6 = vld [vmem:[#allocation2] sm:$0xff]   ;;  %v1102_v7 = vmov 4   ;;  %v1103_v8 = vmov 5   ;;  %v991_v9 = vld [vmem:[#allocation2 + $0x8] sm:$0xff]  }
  0x16   :  { %329 = vmatprep.mubr.bf16.mxu1 %v1098_v1  ;;  %914 = vmatprep.subr.bf16.mxu0 %v1099_v2  ;;  %v1104_v10 = vmov 6   ;;  %v992_v11 = vld [vmem:[#allocation2 + $0x10] sm:$0xff]   ;;  %vm1105_vm0 = vmmov 0   ;;  %v1163_v12 = vld [vmem:[#allocation2 + $0x78] sm:$0xff]   ;;  %v999_v15 = vld [vmem:[#allocation2 + $0x40] sm:$0xff]   ;;  %v32_v21 = vand.u32 127, %v31_v20 }
  0x17   :  { %48 = vperm.xlu1 %978, %v1150_v3   ;;  %34 = vperm.xlu0 %976, %v1150_v3   ;;  %v995_v13 = vld [vmem:[#allocation2 + $0x38] sm:$0xff]   ;;  %v1000_v16 = vld [vmem:[#allocation2 + $0x20] sm:$0xff]   ;;  %v1003_v17 = vld [vmem:[#allocation2 + $0x48] sm:$0xff]   ;;  %vm107_vm8 = vcmask 392192   ;;  %vm293_vm9 = vcmask 523264   ;;  %v1106_v60 = vmov 7  }
  0x18   :  { %915 = vmatpush3.bf16.msra.mxu0 %v990_v6  ;;  %920 = vmatprep.mubr.msk.bf16.mxu0 %vm1105_vm0, %v1099_v2  ;;  %v996_v14 = vld [vmem:[#allocation2 + $0x18] sm:$0xff]   ;;  %v1004_v18 = vld [vmem:[#allocation2 + $0x28] sm:$0xff]   ;;  %v1007_v19 = vld [vmem:[#allocation2 + $0x50] sm:$0xff]   ;;  %v1184_v61 = vshrl.u32 %v31_v20, 7  ;;  %vm585_vm14 = vcmask 1041408   ;;  %s1107_s0 = smov 112  }
  0x19   :  { %916 = vmatprep.subr.bf16.mxu0 %v1099_v2  ;;  %297 = vmatprep.subr.bf16.mxu1 %v995_v13  ;;  %v994_v42 = vld [vmem:[#allocation2 + $0x58] sm:$0xff]   ;;  %v997_v44 = vld [vmem:[#allocation2 + $0x80] sm:$0xff]   ;;  %v1001_v46 = vld [vmem:[#allocation2 + $0x88] sm:$0xff]   ;;  %s1108_s1 = smov [#allocation6]  }
  0x1a   :  { %298 = vmatpush1.bf16.msra.mxu1 %v996_v14  ;;  %v998_v45 = vld [vmem:[#allocation2 + $0x60] sm:$0xff]   ;;  %v1002_v47 = vld [vmem:[#allocation2 + $0x68] sm:$0xff]   ;;  %v1005_v48 = vld [vmem:[#allocation2 + $0x90] sm:$0xff]   ;;  %v340_v63 = vsub.s32 2, %v1184_v61  ;;  %s832_s28 = sshll.u32 %s1108_s1, 4  ;;  %s833_s28 = int_to_ptr.vmem [resolvable:$true] %s832_s28 }
  0x1b   :  { %979 = vset.pattern.permute.xlu1 %v1100_v4  ;;  %977 = vset.pattern.permute.xlu0 %v1101_v5  ;;  %v1006_v49 = vld [vmem:[#allocation2 + $0x70] sm:$0xff]   ;;  %v151_v62 = vld [vmem:[#allocation2 + $0xe0] sm:$0xf]  ;;  %v287_v4 = vsub.s32 0, %v1184_v61  ;;  %s1056_s29 = scalar_lea.vmem %s833_s28, 32  ;;  %p1061_p9 = scmp.lt.s32.totalorder %s833_s28, %s833_s28 }
  0x1c   :  { %55 = vperm.xlu1 %979, %v1150_v3   ;;  %41 = vperm.xlu0 %977, %v1150_v3   ;;  %v1008_v50 = vld [vmem:[#allocation2 + $0x30] sm:$0xff]   ;;  %v1187_v0 = vunpack.c.l.bf16 %v151_v62  ;;  %p1057_p8 = scmp.ne.s32.totalorder %s833_s28, %s1056_s29  ;;  %p1062_p10 = scmp.lt.s32.totalorder %s1056_s29, %s1056_s29 }
  0x1d   :  { %917 = vmatpush3.bf16.msra.mxu0 %v991_v9  ;;  %299 = vmatprep.subr.bf16.mxu1 %v999_v15 }
  0x1e   :  { %918 = vmatprep.subr.bf16.mxu0 %v1099_v2  ;;  %300 = vmatpush1.bf16.msra.mxu1 %v1000_v16  ;;  %v341_v5 = vrot.slane %v1187_v0, %v340_v63  ;;  %v288_v6 = vrot.slane %v1187_v0, %v287_v4  ;;  %v154_v15 = vrot.slane %v1187_v0, 1  ;;  %p1063_p11 = por %p1062_p10, %p1061_p9 }
  0x1f   :  { %301 = vmatprep.subr.bf16.mxu1 %v1003_v17 }
  0x20   :  { %980 = vset.pattern.permute.xlu1 %v1102_v7  ;;  %981 = vset.pattern.permute.xlu0 %v1103_v8  ;;  %v345_v16 = vrot.slane %v154_v15, %v340_v63  ;;  %p1064_p12 = pnand %p1063_p11, %p1057_p8 }
  0x21   :  { %62 = vperm.xlu1 %980, %v1150_v3   ;;  %69 = vperm.xlu0 %981, %v1150_v3  }
  0x22   :  { %919 = vmatpush3.bf16.msra.mxu0 %v992_v11  ;;  %302 = vmatpush1.bf16.msra.mxu1 %v1004_v18 }
  0x23   :  { %349 = vmatprep.subr.bf16.mxu0 %v1163_v12  ;;  %303 = vmatprep.subr.bf16.mxu1 %v1007_v19  ;;  %v292_v19 = vrot.slane %v154_v15, %v287_v4 }
  0x25   :  { %982 = vset.pattern.permute.xlu1 %v1104_v10  ;;  %989 = vset.pattern.permute.xlu0 %v1106_v60 }
  0x26   :  { %76 = vperm.xlu1 %982, %v1150_v3   ;;  %304 = vmatpush1.bf16.msra.mxu1 %v1008_v50 }
  0x27   :  { %421 = vmatprep.subr.bf16.mxu1 %v1163_v12 }
  0x2a   :  { %983 = vset.pattern.permute.xlu1 %v1106_v60 }
  0x96   :  { %v49_v22 = vpop.permute.xlu1 %48  ;;  %v35_v23 = vpop.permute.xlu0 %34 }
  0x97   :  { %vm36_vm1 = vcmp.eq.s32.totalorder %v32_v21, %v35_v23  ;;  %vm50_vm2 = vcmp.eq.s32.totalorder %v32_v21, %v49_v22 }
  0x98   :  { %v854_v26 = vsel %vm36_vm1, 1.0, %v1099_v2  ;;  %v856_v29 = vsel %vm50_vm2, 1.0, %v1099_v2  ;;  %vm620_vm2 = vcmask 261120  }
  0x9b   :  { %v56_v24 = vpop.permute.xlu1 %55  ;;  %v42_v25 = vpop.permute.xlu0 %41 }
  0x9c   :  { %vm43_vm3 = vcmp.eq.s32.totalorder %v32_v21, %v42_v25  ;;  %vm57_vm4 = vcmp.eq.s32.totalorder %v32_v21, %v56_v24  ;;  %v882_v25 = vadd.s32 4294967295, %v1150_v3 }
  0x9d   :  { %v855_v27 = vsel %vm43_vm3, 1.0, %v1099_v2  ;;  %v857_v33 = vsel %vm57_vm4, 1.0, %v1099_v2  ;;  %vm768_vm3 = vcmask 130048  }
  0x9e   :  { %v46_v28 = vadd.f32 %v855_v27, %v854_v26  ;;  %vm407_vm10 = vcmp.eq.s32.totalorder %v882_v25, 0  ;;  %vm487_vm11 = vcmp.eq.s32.totalorder %v882_v25, 1 }
  0x9f   :  { %v408_v27 = vsel %vm407_vm10, 1, %v1098_v1  ;;  %v488_v3 = vsel %vm487_vm11, 1, %v1098_v1 }
  0xa0   :  { %v53_v30 = vadd.f32 %v856_v29, %v46_v28  ;;  %v63_v31 = vpop.permute.xlu1 %62  ;;  %v70_v32 = vpop.permute.xlu0 %69 }
  0xa1   :  { %vm64_vm5 = vcmp.eq.s32.totalorder %v32_v21, %v63_v31  ;;  %vm71_vm6 = vcmp.eq.s32.totalorder %v32_v21, %v70_v32 }
  0xa2   :  { %v60_v34 = vadd.f32 %v857_v33, %v53_v30  ;;  %v858_v35 = vsel %vm64_vm5, 1.0, %v1099_v2  ;;  %v859_v36 = vsel %vm71_vm6, 1.0, %v1099_v2 }
  0xa4   :  { %v67_v37 = vadd.f32 %v858_v35, %v60_v34 }
  0xa5   :  { %v77_v38 = vpop.permute.xlu1 %76 }
  0xa6   :  { %v74_v39 = vadd.f32 %v859_v36, %v67_v37  ;;  %vm78_vm7 = vcmp.eq.s32.totalorder %v32_v21, %v77_v38 }
  0xa7   :  { %v860_v40 = vsel %vm78_vm7, 1.0, %v1099_v2 }
  0xa8   :  { %v81_v41 = vadd.f32 %v860_v40, %v74_v39 }
  0xaa   :  { %v88_v43 = vpack.c.bf16 %v81_v41, %v81_v41 }
  0xac   :  { %921 = vmatmul.mubr.msk.bf16.vlgmr.msra.gmra.mrb[0].mxu0 %vm107_vm8, %v88_v43 }
  0xad   :  { %350 = vmatpush1.bf16.msra.mxu0 %v994_v42  ;;  %381 = vmatprep.mubr.bf16.mxu0 %v1098_v1 }
  0xae   :  { %351 = vmatprep.subr.bf16.mxu0 %v997_v44 }
  0xb1   :  { %352 = vmatpush1.bf16.msra.mxu0 %v998_v45 }
  0xb2   :  { %353 = vmatprep.subr.bf16.mxu0 %v1001_v46 }
  0xb5   :  { %354 = vmatpush1.bf16.msra.mxu0 %v1002_v47 }
  0xb6   :  { %355 = vmatprep.subr.bf16.mxu0 %v1005_v48 }
  0xb9   :  { %356 = vmatpush1.bf16.msra.mxu0 %v1006_v49 }
  0xba   :  { %924 = vmatprep.subr.bf16.mxu0 %v1099_v2 }
  0xbc   :  { %382 = vmatmul.mubr.bf16.vlgmr.msra.gmra.mrb[4].mxu0 %v1098_v1 }
  0xbd   :  { %932 = vmatprep.mubr.msk.bf16.mxu0 %vm1105_vm0, %v1099_v2 }
 0x17f   :  { %v145_v51 = vpop.f32.mrb[0].mxu0 }
 0x180   :  { %v284_v52 = vpack.c.bf16 %v145_v51, %v145_v51  ;;  %v922_v53 = vpop.f32.mrb[1].mxu0 }
 0x181   :  { %v148_v54 = vpop.f32.mrb[2].mxu0 }
 0x182   :  { %v923_v55 = vpop.f32.mrb[3].mxu0  ;;  %881 = vmatmul.mubr.msk.bf16.vlgmr.msra.gmra.mrb[0].mxu1 %vm293_vm9, %v284_v52  ;;  %v1010_v52 = vld [vmem:[#allocation2 + $0xa0] sm:$0xff]   ;;  %v1011_v54 = vld [vmem:[#allocation2 + $0xa8] sm:$0xff]  }
 0x183   :  { %422 = vmatpush1.bf16.msra.mxu1 %v994_v42  ;;  %453 = vmatprep.mubr.bf16.mxu1 %v1098_v1  ;;  %v1009_v1 = vld [vmem:[#allocation2 + $0x98] sm:$0xff]   ;;  %v1012_v55 = vld [vmem:[#allocation2 + $0xb0] sm:$0xff]  }
 0x184   :  { %423 = vmatprep.subr.bf16.mxu1 %v997_v44  ;;  %925 = vmatpush3.bf16.msra.mxu0 %v1009_v1 }
 0x185   :  { %926 = vmatprep.subr.bf16.mxu0 %v1099_v2 }
 0x187   :  { %424 = vmatpush1.bf16.msra.mxu1 %v998_v45 }
 0x188   :  { %425 = vmatprep.subr.bf16.mxu1 %v1001_v46  ;;  %927 = vmatpush3.bf16.msra.mxu0 %v1010_v52 }
 0x189   :  { %928 = vmatprep.subr.bf16.mxu0 %v1099_v2 }
 0x18b   :  { %426 = vmatpush1.bf16.msra.mxu1 %v1002_v47 }
 0x18c   :  { %427 = vmatprep.subr.bf16.mxu1 %v1005_v48  ;;  %929 = vmatpush3.bf16.msra.mxu0 %v1011_v54 }
 0x18d   :  { %930 = vmatprep.subr.bf16.mxu0 %v1099_v2 }
 0x18f   :  { %v383_v56 = vpop.f32.mrb[4].mxu0  ;;  %428 = vmatpush1.bf16.msra.mxu1 %v1006_v49 }
 0x190   :  { %v385_v57 = vpop.f32.mrb[5].mxu0  ;;  %936 = vmatprep.subr.bf16.mxu1 %v1099_v2  ;;  %v384_v7 = vadd.f32 %v383_v56, %v341_v5  ;;  %931 = vmatpush3.bf16.msra.mxu0 %v1012_v55 }
 0x191   :  { %v387_v58 = vpop.f32.mrb[6].mxu0  ;;  %v386_v20 = vadd.f32 %v385_v57, %v345_v16  ;;  %952 = vmatprep.subr.bf16.mxu0 %v1099_v2 }
 0x192   :  { %v388_v59 = vpop.f32.mrb[7].mxu0 }
 0x255   :  { %v331_v8 = vpop.f32.mrb[0].mxu1 }
 0x256   :  { %v332_v9 = vadd.f32 %v331_v8, %v288_v6  ;;  %v333_v10 = vpop.f32.mrb[1].mxu1 }
 0x257   :  { %v335_v11 = vpop.f32.mrb[2].mxu1  ;;  %v334_v22 = vadd.f32 %v333_v10, %v292_v19 }
 0x258   :  { %v390_v12 = vadd.f32 %v384_v7, %v332_v9  ;;  %v336_v13 = vpop.f32.mrb[3].mxu1 }
 0x25a   :  { %v391_v14 = vmul.f32 0.5, %v390_v12  ;;  %v515_v12 = vsub.s32 4, %v1184_v61 }
 0x25c   :  { %1018 = vtanh.f32 %v391_v14  ;;  %v516_v13 = vrot.slane %v1187_v0, %v515_v12 }
 0x266   :  { %v1019_v17 = vpop.eup %1018 }
 0x267   :  { %v393_v18 = vadd.f32 1.0, %v1019_v17 }
 0x269   :  { %v394_v21 = vmul.f32 0.5, %v393_v18 }
 0x26b   :  { %v395_v23 = vmul.f32 %v394_v21, %v386_v20  ;;  %v398_v28 = vsub.f32 1.0, %v394_v21  ;;  %v404_v30 = vmul.f32 0.0, %v394_v21  ;;  %v1013_v21 = vld [vmem:[#allocation2 + $0xb8] sm:$0xff]  }
 0x26d   :  { %v396_v24 = vadd.f32 %v395_v23, %v334_v22 }
 0x26f   :  { %1020 = vtanh.f32 %v396_v24 }
 0x279   :  { %v1021_v26 = vpop.eup %1020 }
 0x27a   :  { %400 = vrot.lane.b32.xlu1 %v1021_v26, %s1095_s22 }
 0x27e   :  { %410 = vperm.xlu1 %983, %v408_v27  }
 0x282   :  { %490 = vperm.xlu1 %983, %v488_v3   ;;  %v606_v3 = vsub.s32 5, %v1184_v61 }
 0x2ec   :  { %v401_v29 = vpop.permute.xlu1 %400 }
 0x2ed   :  { %v403_v31 = vmul.f32 %v401_v29, %v398_v28 }
 0x2ef   :  { %v405_v32 = vadd.f32 %v404_v30, %v403_v31 }
 0x2f1   :  { %v414_v33 = vpack.c.bf16 %v405_v32, %v405_v32  ;;  %v483_v48 = vrot.slane %v405_v32, 6 }
 0x2f3   :  { %416 = vrot.lane.b32.xlu0 %v414_v33, %s1095_s22 }
 0x2fd   :  { %v411_v57 = vpop.permute.xlu1 %410 }
 0x2fe   :  { %vm412_vm12 = vcmp.eq.s32.totalorder %v411_v57, 1 }
 0x2ff   :  { %v413_v63 = vsel %vm412_vm12, %v405_v32, 0.0  ;;  %v1015_v32 = vld [vmem:[#allocation2 + $0xc8] sm:$0xff]  }
 0x365   :  { %v417_v34 = vpop.permute.xlu0 %416 }
 0x366   :  { %883 = vmatmul.mubr.msk.bf16.vlgmr.msra.gmra.mrb[4].mxu1 %vm293_vm9, %v417_v34  ;;  %v1016_v34 = vld [vmem:[#allocation2 + $0xd0] sm:$0xff]  }
 0x367   :  { %940 = vmatprep.mubr.msk.bf16.mxu1 %vm1105_vm0, %v1099_v2  ;;  %937 = vmatpush3.bf16.msra.mxu1 %v1013_v21 }
 0x368   :  { %938 = vmatprep.subr.bf16.mxu1 %v1099_v2 }
 0x439   :  { %v455_v35 = vpop.f32.mrb[4].mxu1 }
 0x43a   :  { %v456_v36 = vadd.f32 %v455_v35, %v341_v5  ;;  %v457_v37 = vpop.f32.mrb[5].mxu1  ;;  %v491_v5 = vpop.permute.xlu1 %490  ;;  %v607_v35 = vrot.slane %v1187_v0, %v606_v3 }
 0x43b   :  { %v459_v38 = vpop.f32.mrb[6].mxu1  ;;  %v458_v43 = vadd.f32 %v457_v37, %v345_v16  ;;  %vm492_vm13 = vcmp.eq.s32.totalorder %v491_v5, 1 }
 0x43c   :  { %v463_v39 = vrot.slane %v456_v36, 6  ;;  %v460_v40 = vpop.f32.mrb[7].mxu1 }
 0x43d   :  { %v471_v47 = vrot.slane %v458_v43, 6  ;;  %v672_v43 = vsub.s32 6, %v1184_v61 }
 0x43e   :  { %v465_v41 = vadd.f32 %v463_v39, %v332_v9 }
 0x440   :  { %v466_v42 = vmul.f32 0.5, %v465_v41 }
 0x442   :  { %1022 = vtanh.f32 %v466_v42 }
 0x44c   :  { %v1023_v44 = vpop.eup %1022 }
 0x44d   :  { %v468_v45 = vadd.f32 1.0, %v1023_v44  ;;  %v673_v44 = vrot.slane %v1187_v0, %v672_v43 }
 0x44f   :  { %v469_v46 = vmul.f32 0.5, %v468_v45 }
 0x451   :  { %v473_v49 = vmul.f32 %v471_v47, %v469_v46  ;;  %v485_v50 = vmul.f32 %v483_v48, %v469_v46  ;;  %v476_v56 = vsub.f32 1.0, %v469_v46 }
 0x453   :  { %v474_v51 = vadd.f32 %v473_v49, %v334_v22  ;;  %v1014_v22 = vld [vmem:[#allocation2 + $0xc0] sm:$0xff]  }
 0x454   :  { %939 = vmatpush3.bf16.msra.mxu1 %v1014_v22 }
 0x455   :  { %1024 = vtanh.f32 %v474_v51  ;;  %944 = vmatprep.subr.bf16.mxu1 %v1099_v2 }
 0x45f   :  { %v1025_v53 = vpop.eup %1024 }
 0x460   :  { %478 = vrot.lane.b32.xlu0 %v1025_v53, %s1095_s22 }
 0x4d2   :  { %v479_v58 = vpop.permute.xlu0 %478 }
 0x4d3   :  { %v481_v59 = vmul.f32 %v479_v58, %v476_v56  ;;  %v1017_v56 = vld [vmem:[#allocation2 + $0xd8] sm:$0xff]  }
 0x4d5   :  { %v486_v60 = vadd.f32 %v485_v50, %v481_v59  ;;  %v746_v50 = vsub.s32 7, %v1184_v61 }
 0x4d7   :  { %v494_v62 = vrot.slane %v486_v60, 2  ;;  %v747_v51 = vrot.slane %v1187_v0, %v746_v50 }
 0x4d9   :  { %v984_v4 = vpack.i.bf16 %v413_v63, %v494_v62 }
 0x4db   :  { %985 = vrot.lane.b32.xlu0 %v984_v4, %s1095_s22 }
 0x54d   :  { %v986_v6 = vpop.permute.xlu0 %985 }
 0x54e   :  { %v988_v7 = vunpack.i.h.bf16 %v986_v6  ;;  %v987_v8 = vunpack.i.l.bf16 %v986_v6 }
 0x550   :  { %v502_v9 = vsel %vm492_vm13, %v987_v8, %v988_v7 }
 0x551   :  { %v503_v10 = vmax.f32 %v502_v9, 0.0 }
 0x553   :  { %v504_v11 = vpack.c.bf16 %v503_v10, %v503_v10 }
 0x555   :  { %933 = vmatmul.mubr.msk.bf16.vlgmr.msra.gmra.mrb[8].mxu0 %vm293_vm9, %v504_v11 }
 0x556   :  { %954 = vmatprep.mubr.msk.bf16.mxu0 %vm1105_vm0, %v1099_v2  ;;  %953 = vmatpush3.bf16.msra.mxu0 %v1017_v56 }
 0x628   :  { %v578_v14 = vpop.f32.mrb[8].mxu0 }
 0x629   :  { %v579_v15 = vadd.f32 %v578_v14, %v516_v13  ;;  %v934_v16 = vpop.f32.mrb[9].mxu0 }
 0x62a   :  { %v581_v17 = vpop.f32.mrb[10].mxu0 }
 0x62b   :  { %v935_v18 = vpop.f32.mrb[11].mxu0  ;;  %v584_v19 = vmul.f32 %v579_v15, %v579_v15 }
 0x62d   :  { %v586_v20 = vsel %vm585_vm14, %v584_v19, 0.0 }
 0x62e   :  { %587 = vadd.xlane.f32.xlu1 %v586_v20 }
 0x63f   :  { %750 = vrot.lane.b32.xlu1 %v747_v51, %s1107_s0 }
 0x6bb   :  { %v588_v23 = vpop.xlane.xlu1 %587 }
 0x6bc   :  { %1026 = vrsqrt.f32 %v588_v23  ;;  %vm591_vm15 = vcmp.eq.f32.partialorder %v588_v23, inf  ;;  %v594_v26 = vand.u32 2147483648, %v588_v23  ;;  %vm593_vm1 = vcmp.eq.f32.partialorder %v588_v23, 0.0 }
 0x6bf   :  { %v751_v61 = vpop.permute.xlu1 %750 }
 0x6c6   :  { %v1027_v24 = vpop.eup %1026 }
 0x6c7   :  { %v590_v25 = vmul.f32 %v1027_v24, %v588_v23 }
 0x6c9   :  { %v592_v27 = vsel %vm591_vm15, %v588_v23, %v590_v25 }
 0x6ca   :  { %v595_v28 = vsel %vm593_vm1, %v594_v26, %v592_v27 }
 0x6cb   :  { %v596_v29 = vadd.f32 1.0, %v595_v28 }
 0x6cd   :  { %1028 = vrcp.f32 %v596_v29 }
 0x6d7   :  { %v1029_v30 = vpop.eup %1028 }
 0x6d8   :  { %v598_v31 = vmul.f32 %v1029_v30, %v579_v15 }
 0x6da   :  { %v599_v33 = vpack.c.bf16 %v598_v31, %v598_v31 }
 0x6dc   :  { %941 = vmatmul.mubr.msk.bf16.vlgmr.msra.gmra.mrb[8].mxu1 %vm620_vm2, %v599_v33 }
 0x6dd   :  { %945 = vmatpush3.bf16.msra.mxu1 %v1015_v32  ;;  %948 = vmatprep.mubr.msk.bf16.mxu1 %vm1105_vm0, %v1099_v2  ;;  %vm729_vm0 = vcmask 123904  }
 0x6de   :  { %946 = vmatprep.subr.bf16.mxu1 %v1099_v2 }
 0x6e1   :  { %947 = vmatpush3.bf16.msra.mxu1 %v1016_v34 }
 0x7af   :  { %v658_v36 = vpop.f32.mrb[8].mxu1 }
 0x7b0   :  { %v659_v37 = vadd.f32 %v658_v36, %v607_v35  ;;  %v942_v38 = vpop.f32.mrb[9].mxu1 }
 0x7b1   :  { %v661_v39 = vpop.f32.mrb[10].mxu1 }
 0x7b2   :  { %v664_v40 = vmax.f32 %v659_v37, 0.0  ;;  %v943_v41 = vpop.f32.mrb[11].mxu1 }
 0x7b4   :  { %v665_v42 = vpack.c.bf16 %v664_v40, %v664_v40 }
 0x7b6   :  { %949 = vmatmul.mubr.msk.bf16.vlgmr.msra.gmra.mrb[12].mxu1 %vm620_vm2, %v665_v42 }
 0x889   :  { %v723_v2 = vpop.f32.mrb[12].mxu1 }
 0x88a   :  { %v724_v45 = vadd.f32 %v723_v2, %v673_v44  ;;  %v950_v46 = vpop.f32.mrb[13].mxu1 }
 0x88b   :  { %v726_v47 = vpop.f32.mrb[14].mxu1 }
 0x88c   :  { %v951_v48 = vpop.f32.mrb[15].mxu1  ;;  %v730_v49 = vsel %vm729_vm0, %v724_v45, 0.0 }
 0x88d   :  { %731 = vadd.xlane.f32.xlu0 %v730_v49 }
 0x91a   :  { %v732_v1 = vpop.xlane.xlu0 %731 }
 0x91b   :  { %v734_v52 = vmul.f32 0.0625, %v732_v1 }
 0x91d   :  { %v735_v53 = vsub.f32 %v724_v45, %v734_v52 }
 0x91f   :  { %v736_v54 = vmul.f32 %v735_v53, %v735_v53 }
 0x921   :  { %v737_v55 = vsel %vm729_vm0, %v736_v54, 0.0 }
 0x922   :  { %738 = vadd.xlane.f32.xlu0 %v737_v55 }
 0x9af   :  { %v739_v57 = vpop.xlane.xlu0 %738 }
 0x9b0   :  { %v740_v58 = vmul.f32 0.0625, %v739_v57 }
 0x9b2   :  { %v741_v59 = vadd.f32 1e-05, %v740_v58 }
 0x9b4   :  { %1030 = vrsqrt.f32 %v741_v59 }
 0x9be   :  { %v1031_v60 = vpop.eup %1030 }
 0x9bf   :  { %v743_v62 = vmul.f32 %v1031_v60, %v735_v53 }
 0x9c1   :  { %v748_v63 = vmul.f32 %v747_v51, %v743_v62 }
 0x9c3   :  { %v753_v0 = vadd.f32 %v751_v61, %v748_v63 }
 0x9c5   :  { %v755_v4 = vmul.f32 0.5, %v753_v0  ;;  %754 = vst.msk [vmem:[#allocation6] sm:$0x3] %vm729_vm0, %v753_v0 }
 0x9c7   :  { %1032 = vtanh.f32 %v755_v4 }
 0x9d1   :  { %v1033_v5 = vpop.eup %1032 }
 0x9d2   :  { %v757_v6 = vadd.f32 1.0, %v1033_v5 }
 0x9d4   :  { %v758_v7 = vmul.f32 0.5, %v757_v6 }
 0x9d6   :  { %v759_v8 = vpack.c.bf16 %v758_v7, %v758_v7 }
 0x9d8   :  { %955 = vmatmul.mubr.msk.bf16.vlgmr.msra.gmra.mrb[12].mxu0 %vm768_vm3, %v759_v8 }
 0xaab   :  { %v806_v9 = vpop.f32.mrb[12].mxu0 }
 0xaac   :  { %v812_v10 = vmul.f32 %v806_v9, %v758_v7  ;;  %v956_v11 = vpop.f32.mrb[13].mxu0 }
 0xaad   :  { %v809_v12 = vpop.f32.mrb[14].mxu0 }
 0xaae   :  { %v957_v13 = vpop.f32.mrb[15].mxu0  ;;  %v813_v14 = vsel %vm729_vm0, %v812_v10, 0.0 }
 0xaaf   :  { %814 = vadd.xlane.f32.xlu0 %v813_v14 }
 0xab0   :  { %1067 = shalt.err (!%p1064_p12)
}
 0xab1   :  { %s1068_s5 = scalar_lea.hbm %s1255_s2, 32 }
 0xab2   :  { %p1069_p13 = scmp.ne.s32.totalorder %s1255_s2, %s1068_s5  ;;  %p1072_p0 = scmp.lt.u32.totalorder %s1068_s5, %s1255_s2 }
 0xab4   :  { %p1074_p1 = pnand %p1072_p0, %p1069_p13 }
 0xab6   :  { %1077 = shalt.err (!%p1074_p1)
}
 0xab7   :  { %835 = dma.vmem_to_hbm [thread:$0]  %s833_s28, 32, %s1255_s2, [#allocation4]  }
 0xab8   :  { %s1078_s16 = scalar_lea.hbm %s1256_s3, 16 }
 0xab9   :  { %p1079_p2 = scmp.ne.s32.totalorder %s1256_s3, %s1078_s16  ;;  %p1082_p3 = scmp.lt.u32.totalorder %s1078_s16, %s1256_s3 }
 0xabb   :  { %p1084_p4 = pnand %p1082_p3, %p1079_p2 }
 0xb3c   :  { %v815_v15 = vpop.xlane.xlu0 %814 }
 0xb3d   :  { %v816_v16 = vrot.slane %v815_v15, 4 }
 0xb3f   :  { %v817_v17 = vadd.f32 %v816_v16, %v815_v15 }
 0xb41   :  { %v818_v18 = vrot.slane %v817_v17, 2 }
 0xb43   :  { %v819_v19 = vadd.f32 %v818_v18, %v817_v17 }
 0xb45   :  { %v820_v20 = vrot.slane %v819_v19, 1 }
 0xb47   :  { %v821_v21 = vadd.f32 %v820_v20, %v819_v19 }
 0xb49   :  { %958 = vpush %v821_v21 }
 0xb7a   :  { %s959_s12 = spop %958 }
 0xb7b   :  { %s823_s13 = smul.f32 0.0005, %s959_s12 }
 0xb7d   :  { %825 = sst [smem:[#allocation7]] %s823_s13 }
 0xb7e   :  { %1087 = shalt.err (!%p1084_p4)
}
 0xb7f   :  { %s1109_s20 = smov [#allocation7]  }
 0xb80   :  { %843 = dma.smem_to_hbm %s1109_s20, 16, %s1256_s3, [#allocation5]  }
 0xb81   :  { %1090 = dma.done.wait [#allocation4], 32  }
 0xb82   :  { %1091 = vsyncadd [#allocation4], 4294967264 }
 0xb83   :  { %1092 = dma.done.wait [#allocation5], 16  }
 0xb84   :  { %1093 = vsyncadd [#allocation5], 4294967280 }
 0xb85   :  { %850 = sfence }
 0xb86   :  { %851 = vsyncpa [#allocation3], 1 }
 0xb87   :  { %852 = vsyncpa [#allocation4], 1 }
 0xb88   :  { %853 = vsyncpa [#allocation5], 1 }

</bundles_post_ra>
